<compile_context>
chip_gen: v7x
topology: tpu7x:2x2x1
jax: 0.10.0
libtpu: 0.0.40
codegen_flags: <defaults>
</compile_context>

<pallas_src>
import jax
import jax.numpy as jnp
from jax import lax
from jax.experimental import pallas as pl
from jax.experimental.pallas import tpu as pltpu


def _round_up(x: int, m: int) -> int:
    return (x + m - 1) // m * m


def prepare_head_params(weight, bias, pool_size=None):
    """One-time parameter prep (NOT per-forward).

    weight: (K, C) PyTorch nn.Linear layout; bias: (K,).
    Transposes to (C, Kpad) with lane padding on K only (channels untouched);
    if pool_size (= H*W of the pooled feature map) is given, 1/pool_size is
    folded into the weight so the kernel finalize is just dot + bias.
    """
    k, c = weight.shape
    kpad = _round_up(k, 128)
    w_t = weight.T.astype(jnp.float32)                 # (C, K)
    if pool_size is not None:
        w_t = w_t * (1.0 / float(pool_size))
    w_ck = jnp.zeros((c, kpad), weight.dtype).at[:, :k].set(w_t.astype(weight.dtype))
    b2d = jnp.zeros((1, kpad), bias.dtype).at[0, :k].set(bias)
    return {"w": w_ck, "b": b2d, "c": c, "k": k, "pool_size": pool_size}


def resnet_head(x, params):
    """x: (N, C, H, W) -> (N, K).  params from prepare_head_params."""
    n, c, h, w = x.shape
    hw = h * w
    w_ck, b2d = params["w"], params["b"]
    k = params["k"]
    assert params["c"] == c, "weight/input channel mismatch"
    kpad = w_ck.shape[1]

    x3 = x.reshape(n, c, hw)                # free: row-major reshape, no copy pass
    x_bytes = jnp.dtype(x.dtype).itemsize
    folded = params.get("pool_size", None) == hw
    inv_hw = 1.0 / float(hw)

    # ---------------- VMEM budget (generation-aware) ----------------
    try:
        vmem_cap = int(pltpu.get_tpu_info().vmem_capacity_bytes)
    except Exception:
        vmem_cap = 64 * 1024 * 1024         # conservative (v7x-sized) fallback
    vmem_limit = max(32 * 1024 * 1024, min(vmem_cap * 3 // 4, 100 * 1024 * 1024))

    c_sub = _round_up(c, 8)                 # sublane-padded C (VMEM footprint)
    hw_lane = _round_up(hw, 128)            # lane-padded HW (VMEM footprint)
    w_vmem = _round_up(c, 8) * kpad * jnp.dtype(w_ck.dtype).itemsize
    b_vmem = 8 * kpad * jnp.dtype(b2d.dtype).itemsize

    def x_buf_budget(tm_):
        out_tile = _round_up(tm_, 8) * kpad * x_bytes
        acc = _round_up(tm_, 8) * _round_up(c, 128) * 4
        # weight/bias conservatively counted double-buffered (covers the
        # fallback path); output double-buffered; + Mosaic-internal slack.
        fixed = 2 * w_vmem + 2 * b_vmem + 2 * out_tile + acc + (2 << 20)
        return vmem_limit - fixed

    # ---- batch tile tm: MXU-friendly, shrink to fit, split for parallelism ----
    if n < 8:
        tm = n                               # block == full dim -> always legal
    else:
        tm = 256 if n >= 256 else (128 if n >= 128 else (n // 8) * 8)
        # prefer shrinking tm before splitting HW below the full row
        while tm > 8 and 2 * tm * c_sub * hw_lane * x_bytes > x_buf_budget(tm):
            tm = max(8, _round_up(tm // 2, 8))
        # give the "parallel" N axis >=2 blocks when possible (megacore / 2-TC)
        while (tm >= 16 and (tm // 2) % 8 == 0
               and pl.cdiv(n, tm) < 2 <= pl.cdiv(n, tm // 2)):
            tm //= 2

    # ---- spatial tile th: full HW if it fits, else a multiple of 128 ----
    budget = max(1 << 20, x_buf_budget(tm))
    if 2 * tm * c_sub * hw_lane * x_bytes <= budget:
        th = hw                              # single reduction step per N tile
    else:
        th_cap = budget // (2 * tm * c_sub * x_bytes)
        th = min(hw, max(128, (th_cap // 128) * 128))
    rem = hw % th if th < hw else 0          # static tail size (0 => no masking)

    grid = (pl.cdiv(n, tm), pl.cdiv(hw, th))
    npad = tm * grid[0]

    def head_kernel(x_ref, w_ref, b_ref, o_ref, acc_ref):
        # x_ref: (tm, C, th)   w_ref: (C, Kpad)   b_ref: (1, Kpad)
        # o_ref: (tm, Kpad)    acc_ref: (tm, C) f32 scratch
        s = pl.program_id(1)

        @pl.when(s == 0)
        def _init():
            acc_ref[...] = jnp.zeros_like(acc_ref)

        xv = x_ref[...].astype(jnp.float32)
        if rem:
            # mask the HW tail of the partial last block (OOB reads are garbage)
            lane = lax.broadcasted_iota(jnp.int32, xv.shape, 2)
            xv = jnp.where(lane < (hw - s * th), xv, 0.0)
        acc_ref[...] += jnp.sum(xv, axis=2)          # lane reduce (XLU slot)

        @pl.when(s == pl.num_programs(1) - 1)
        def _finalize():
            pooled = acc_ref[...]
            if not folded:                           # 1/HW not folded into weight
                pooled = pooled * inv_hw
            wv = w_ref[...]
            lhs = pooled.astype(wv.dtype) if wv.dtype == jnp.bfloat16 else pooled
            out = jnp.dot(lhs, wv, preferred_element_type=jnp.float32)   # MXU
            o_ref[...] = (out + b_ref[...].astype(jnp.float32)).astype(o_ref.dtype)

    cost = pl.CostEstimate(
        flops=n * c * hw + 2 * n * c * k,
        transcendentals=0,
        bytes_accessed=(x3.size * x_bytes
                        + w_ck.size * jnp.dtype(w_ck.dtype).itemsize
                        + b2d.size * jnp.dtype(b2d.dtype).itemsize
                        + n * k * x_bytes),
    )

    def _build(single_buffer_resident):
        wb_kw = {}
        if single_buffer_resident and hasattr(pl, "Buffered"):
            # weight/bias are grid-resident (constant index_map): one buffer.
            wb_kw = dict(pipeline_mode=pl.Buffered(1))
        return pl.pallas_call(
            head_kernel,
            out_shape=jax.ShapeDtypeStruct((npad, kpad), x.dtype),
            grid_spec=pltpu.PrefetchScalarGridSpec(
                num_scalar_prefetch=0,
                grid=grid,
                in_specs=[
                    pl.BlockSpec((tm, c, th), lambda i, s: (i, 0, s)),
                    pl.BlockSpec((c, kpad), lambda i, s: (0, 0), **wb_kw),
                    pl.BlockSpec((1, kpad), lambda i, s: (0, 0), **wb_kw),
                ],
                out_specs=pl.BlockSpec((tm, kpad), lambda i, s: (i, 0)),
                scratch_shapes=[pltpu.VMEM((tm, c), jnp.float32)],
            ),
            compiler_params=pltpu.CompilerParams(
                dimension_semantics=("parallel", "arbitrary"),
                vmem_limit_bytes=int(vmem_limit),
            ),
            cost_estimate=cost,
        )(x3, w_ck, b2d)

    try:
        out_padded = _build(True)
    except Exception:
        # pipeline_mode=pl.Buffered(1) unsupported on this JAX version:
        # fall back to plain (double-buffered) specs; budget already covers it.
        out_padded = _build(False)

    return out_padded[:n, :k]


if __name__ == "__main__":
    # Small shapes consistent with the module: batch=2, in_features(C)=4,
    # spatial=16x16, n_classes=8.
    N, C, H, W, K = 2, 4, 16, 16, 8

    key = jax.random.PRNGKey(0)
    kx, kw, kb = jax.random.split(key, 3)

    x = jax.random.normal(kx, (N, C, H, W), dtype=jnp.float32)
    # PyTorch Linear layout: weight (K, C), bias (K,)
    weight = jax.random.normal(kw, (K, C), dtype=jnp.float32) * 0.1
    bias = jax.random.normal(kb, (K,), dtype=jnp.float32) * 0.1

    # One-time parameter prep (transpose, K lane-pad, fold 1/HW into weight).
    params = prepare_head_params(weight, bias, pool_size=H * W)

    out = resnet_head(x, params)
    out = jax.block_until_ready(out)

    # Reference in plain JAX (same semantics as the PyTorch forward).
    ref = jnp.mean(x, axis=(2, 3)) @ weight.T + bias
    assert out.shape == (N, K)
    assert jnp.allclose(out, ref, atol=1e-5, rtol=1e-5), "mismatch vs reference"

    print("KERNEL_OK")
</pallas_src>

<mosaic_0001>
module attributes {stable_mosaic.version = 11 : i64} {
  func.func @head_kernel(%arg0: i32, %arg1: i32, %arg2: memref<2x4x256xf32, #tpu.memory_space<vmem>>, %arg3: memref<4x128xf32, #tpu.memory_space<vmem>>, %arg4: memref<1x128xf32, #tpu.memory_space<vmem>>, %arg5: memref<2x128xf32, #tpu.memory_space<vmem>>, %arg6: memref<2x4xf32, #tpu.memory_space<vmem>>) attributes {dimension_semantics = [#tpu.dimension_semantics<parallel>, #tpu.dimension_semantics<arbitrary>], iteration_bounds = array<i64: 1, 1>, scalar_prefetch = 0 : i64, scratch_operands = 1 : i64, tpu.core_type = #tpu.core_type<tc>, window_params = [{transform_indices = @transform_0, window_bounds = array<i64: 2, 4, 256>}, {pipeline_mode = #tpu.pipeline_mode<synchronous>, transform_indices = @transform_1, window_bounds = array<i64: 4, 128>}, {pipeline_mode = #tpu.pipeline_mode<synchronous>, transform_indices = @transform_2, window_bounds = array<i64: 1, 128>}, {transform_indices = @transform_3, window_bounds = array<i64: 2, 128>}]} {
    %c0_i32 = arith.constant 0 : i32
    %0 = arith.cmpi eq, %arg1, %c0_i32 : i32
    %1 = arith.extui %0 : i1 to i32
    %c0_i32_0 = arith.constant 0 : i32
    %2 = arith.cmpi ne, %1, %c0_i32_0 : i32
    scf.if %2 {
      %cst_9 = arith.constant 0.000000e+00 : f32
      %11 = vector.broadcast %cst_9 : f32 to vector<2x4xf32>
      %c0_10 = arith.constant 0 : index
      %c0_11 = arith.constant 0 : index
      %12 = vector.load %arg6[%c0_10, %c0_11] : memref<2x4xf32, #tpu.memory_space<vmem>>, vector<2x4xf32>
      tpu.vector_store %arg6[%c0_10, %c0_11], %11 {strides = array<i32>} : memref<2x4xf32, #tpu.memory_space<vmem>>, vector<2x4xf32>,
    } else {
    }
    %c0 = arith.constant 0 : index
    %c0_1 = arith.constant 0 : index
    %c0_2 = arith.constant 0 : index
    %3 = vector.load %arg2[%c0, %c0_1, %c0_2] : memref<2x4x256xf32, #tpu.memory_space<vmem>>, vector<2x4x256xf32>
    %c0_3 = arith.constant 0 : index
    %c0_4 = arith.constant 0 : index
    %4 = vector.load %arg6[%c0_3, %c0_4] : memref<2x4xf32, #tpu.memory_space<vmem>>, vector<2x4xf32>
    %cst = arith.constant dense<0.000000e+00> : vector<2x4xf32>
    %5 = vector.multi_reduction <add>, %3, %cst [2] : vector<2x4x256xf32> to vector<2x4xf32>
    %6 = arith.addf %4, %5 : vector<2x4xf32>
    %c0_5 = arith.constant 0 : index
    %c0_6 = arith.constant 0 : index
    %7 = vector.load %arg6[%c0_5, %c0_6] : memref<2x4xf32, #tpu.memory_space<vmem>>, vector<2x4xf32>
    tpu.vector_store %arg6[%c0_5, %c0_6], %6 {strides = array<i32>} : memref<2x4xf32, #tpu.memory_space<vmem>>, vector<2x4xf32>,
    %c0_i32_7 = arith.constant 0 : i32
    %8 = arith.cmpi eq, %arg1, %c0_i32_7 : i32
    %9 = arith.extui %8 : i1 to i32
    %c0_i32_8 = arith.constant 0 : i32
    %10 = arith.cmpi ne, %9, %c0_i32_8 : i32
    scf.if %10 {
      %c0_9 = arith.constant 0 : index
      %c0_10 = arith.constant 0 : index
      %11 = vector.load %arg6[%c0_9, %c0_10] : memref<2x4xf32, #tpu.memory_space<vmem>>, vector<2x4xf32>
      %c0_11 = arith.constant 0 : index
      %c0_12 = arith.constant 0 : index
      %12 = vector.load %arg3[%c0_11, %c0_12] : memref<4x128xf32, #tpu.memory_space<vmem>>, vector<4x128xf32>
      %cst_13 = arith.constant dense<0.000000e+00> : vector<2x128xf32>
      %13 = tpu.matmul %11, %12, %cst_13 {dimension_numbers = #tpu.dot_dimension_numbers<[1], [0], [0], [1], [0, 0, 1, 1], [], []>} : vector<2x4xf32>, vector<4x128xf32>, vector<2x128xf32> -> vector<2x128xf32>
      %c0_14 = arith.constant 0 : index
      %c0_15 = arith.constant 0 : index
      %14 = vector.load %arg4[%c0_14, %c0_15] : memref<1x128xf32, #tpu.memory_space<vmem>>, vector<1x128xf32>
      %15 = vector.broadcast %14 : vector<1x128xf32> to vector<2x128xf32>
      %16 = arith.addf %13, %15 : vector<2x128xf32>
      %c0_16 = arith.constant 0 : index
      %c0_17 = arith.constant 0 : index
      %17 = vector.load %arg5[%c0_16, %c0_17] : memref<2x128xf32, #tpu.memory_space<vmem>>, vector<2x128xf32>
      tpu.vector_store %arg5[%c0_16, %c0_17], %16 {strides = array<i32>} : memref<2x128xf32, #tpu.memory_space<vmem>>, vector<2x128xf32>,
    } else {
    }
    return
  }
  func.func @transform_0(%arg0: i32, %arg1: i32) -> (i32, i32, i32) {
    %c0_i32 = arith.constant 0 : i32
    %c0_i32_0 = arith.constant 0 : i32
    return %arg0, %c0_i32, %arg1 : i32, i32, i32
  }
  func.func @transform_1(%arg0: i32, %arg1: i32) -> (i32, i32) {
    %c0_i32 = arith.constant 0 : i32
    %c0_i32_0 = arith.constant 0 : i32
    %c0_i32_1 = arith.constant 0 : i32
    return %c0_i32, %c0_i32_0 : i32, i32
  }
  func.func @transform_2(%arg0: i32, %arg1: i32) -> (i32, i32) {
    %c0_i32 = arith.constant 0 : i32
    %c0_i32_0 = arith.constant 0 : i32
    %c0_i32_1 = arith.constant 0 : i32
    return %c0_i32, %c0_i32_0 : i32, i32
  }
  func.func @transform_3(%arg0: i32, %arg1: i32) -> (i32, i32) {
    %c0_i32 = arith.constant 0 : i32
    %c0_i32_0 = arith.constant 0 : i32
    return %arg0, %c0_i32 : i32, i32
  }
}

module attributes {stable_mosaic.version = 11 : i64} {
  func.func @head_kernel(%arg0: i32, %arg1: i32, %arg2: memref<2x4x256xf32, #tpu.memory_space<vmem>>, %arg3: memref<4x128xf32, #tpu.memory_space<vmem>>, %arg4: memref<1x128xf32, #tpu.memory_space<vmem>>, %arg5: memref<2x128xf32, #tpu.memory_space<vmem>>, %arg6: memref<2x4xf32, #tpu.memory_space<vmem>>) attributes {dimension_semantics = [#tpu.dimension_semantics<parallel>, #tpu.dimension_semantics<arbitrary>], iteration_bounds = array<i64: 1, 1>, scalar_prefetch = 0 : i64, scratch_operands = 1 : i64, tpu.core_type = #tpu.core_type<tc>, window_params = [{transform_indices = @transform_0, window_bounds = array<i64: 2, 4, 256>}, {pipeline_mode = #tpu.pipeline_mode<synchronous>, transform_indices = @transform_1, window_bounds = array<i64: 4, 128>}, {pipeline_mode = #tpu.pipeline_mode<synchronous>, transform_indices = @transform_2, window_bounds = array<i64: 1, 128>}, {transform_indices = @transform_3, window_bounds = array<i64: 2, 128>}]} {
    %c0_i32 = arith.constant 0 : i32
    %0 = arith.cmpi eq, %arg1, %c0_i32 : i32
    %1 = arith.extui %0 : i1 to i32
    %c0_i32_0 = arith.constant 0 : i32
    %2 = arith.cmpi ne, %1, %c0_i32_0 : i32
    scf.if %2 {
      %cst_9 = arith.constant 0.000000e+00 : f32
      %11 = vector.broadcast %cst_9 : f32 to vector<2x4xf32>
      %c0_10 = arith.constant 0 : index
      %c0_11 = arith.constant 0 : index
      %12 = vector.load %arg6[%c0_10, %c0_11] : memref<2x4xf32, #tpu.memory_space<vmem>>, vector<2x4xf32>
      tpu.vector_store %arg6[%c0_10, %c0_11], %11 {strides = array<i32>} : memref<2x4xf32, #tpu.memory_space<vmem>>, vector<2x4xf32>,
    } else {
    }
    %c0 = arith.constant 0 : index
    %c0_1 = arith.constant 0 : index
    %c0_2 = arith.constant 0 : index
    %3 = vector.load %arg2[%c0, %c0_1, %c0_2] : memref<2x4x256xf32, #tpu.memory_space<vmem>>, vector<2x4x256xf32>
    %c0_3 = arith.constant 0 : index
    %c0_4 = arith.constant 0 : index
    %4 = vector.load %arg6[%c0_3, %c0_4] : memref<2x4xf32, #tpu.memory_space<vmem>>, vector<2x4xf32>
    %cst = arith.constant dense<0.000000e+00> : vector<2x4xf32>
    %5 = vector.multi_reduction <add>, %3, %cst [2] : vector<2x4x256xf32> to vector<2x4xf32>
    %6 = arith.addf %4, %5 : vector<2x4xf32>
    %c0_5 = arith.constant 0 : index
    %c0_6 = arith.constant 0 : index
    %7 = vector.load %arg6[%c0_5, %c0_6] : memref<2x4xf32, #tpu.memory_space<vmem>>, vector<2x4xf32>
    tpu.vector_store %arg6[%c0_5, %c0_6], %6 {strides = array<i32>} : memref<2x4xf32, #tpu.memory_space<vmem>>, vector<2x4xf32>,
    %c0_i32_7 = arith.constant 0 : i32
    %8 = arith.cmpi eq, %arg1, %c0_i32_7 : i32
    %9 = arith.extui %8 : i1 to i32
    %c0_i32_8 = arith.constant 0 : i32
    %10 = arith.cmpi ne, %9, %c0_i32_8 : i32
    scf.if %10 {
      %c0_9 = arith.constant 0 : index
      %c0_10 = arith.constant 0 : index
      %11 = vector.load %arg6[%c0_9, %c0_10] : memref<2x4xf32, #tpu.memory_space<vmem>>, vector<2x4xf32>
      %c0_11 = arith.constant 0 : index
      %c0_12 = arith.constant 0 : index
      %12 = vector.load %arg3[%c0_11, %c0_12] : memref<4x128xf32, #tpu.memory_space<vmem>>, vector<4x128xf32>
      %cst_13 = arith.constant dense<0.000000e+00> : vector<2x128xf32>
      %13 = tpu.matmul %11, %12, %cst_13 {dimension_numbers = #tpu.dot_dimension_numbers<[1], [0], [0], [1], [0, 0, 1, 1], [], []>} : vector<2x4xf32>, vector<4x128xf32>, vector<2x128xf32> -> vector<2x128xf32>
      %c0_14 = arith.constant 0 : index
      %c0_15 = arith.constant 0 : index
      %14 = vector.load %arg4[%c0_14, %c0_15] : memref<1x128xf32, #tpu.memory_space<vmem>>, vector<1x128xf32>
      %15 = vector.broadcast %14 : vector<1x128xf32> to vector<2x128xf32>
      %16 = arith.addf %13, %15 : vector<2x128xf32>
      %c0_16 = arith.constant 0 : index
      %c0_17 = arith.constant 0 : index
      %17 = vector.load %arg5[%c0_16, %c0_17] : memref<2x128xf32, #tpu.memory_space<vmem>>, vector<2x128xf32>
      tpu.vector_store %arg5[%c0_16, %c0_17], %16 {strides = array<i32>} : memref<2x128xf32, #tpu.memory_space<vmem>>, vector<2x128xf32>,
    } else {
    }
    return
  }
  func.func @transform_0(%arg0: i32, %arg1: i32) -> (i32, i32, i32) {
    %c0_i32 = arith.constant 0 : i32
    %c0_i32_0 = arith.constant 0 : i32
    return %arg0, %c0_i32, %arg1 : i32, i32, i32
  }
  func.func @transform_1(%arg0: i32, %arg1: i32) -> (i32, i32) {
    %c0_i32 = arith.constant 0 : i32
    %c0_i32_0 = arith.constant 0 : i32
    %c0_i32_1 = arith.constant 0 : i32
    return %c0_i32, %c0_i32_0 : i32, i32
  }
  func.func @transform_2(%arg0: i32, %arg1: i32) -> (i32, i32) {
    %c0_i32 = arith.constant 0 : i32
    %c0_i32_0 = arith.constant 0 : i32
    %c0_i32_1 = arith.constant 0 : i32
    return %c0_i32, %c0_i32_0 : i32, i32
  }
  func.func @transform_3(%arg0: i32, %arg1: i32) -> (i32, i32) {
    %c0_i32 = arith.constant 0 : i32
    %c0_i32_0 = arith.constant 0 : i32
    return %arg0, %c0_i32 : i32, i32
  }
}

</mosaic_0001>

<bundles_post_ra>
// kernel: tpu_custom_call.1
= control target key start
LH: loop header
LB: loop body
LE: loop exit
PB: predicated region body
PF: predicated region fallthrough
CT: control target
= control target key end

     0   :  { %8 = vsyncpa [#allocation4], 0  ;;  %s355_s0 = inlined_call_operand.hbm [shape: f32[2,4,256], index: 0, kind: input, shape index: {}]   ;;  %s356_s1 = inlined_call_operand.hbm [shape: f32[4,128], index: 1, kind: input, shape index: {}]   ;;  %s357_s2 = inlined_call_operand.vmem [shape: f32[1,128], index: 2, kind: input, shape index: {}]   ;;  %s358_s3 = inlined_call_operand.hbm [shape: f32[2,128], index: 3, kind: output, shape index: {}]  }
   0x1   :  { %9 = vsyncpa [#allocation7], 0 }
   0x2   :  { %10 = vsyncpa [#allocation5], 0  ;;  %s282_s12 = smov [#allocation3]   ;;  %s210_s16 = scalar_lea.hbm %s355_s0, 256 }
   0x3   :  { %s16_s13 = sshll.u32 %s282_s12, 4  ;;  %p211_p0 = scmp.ne.s32.totalorder %s355_s0, %s210_s16  ;;  %s17_s13 = int_to_ptr.vmem [resolvable:$true] %s16_s13 }
   0x4   :  { %p214_p1 = scmp.lt.u32.totalorder %s210_s16, %s355_s0 }
   0x6   :  { %p216_p2 = pnand %p214_p1, %p211_p0 }
   0x8   :  { %219 = shalt.err (!%p216_p2)
}
   0x9   :  { %s220_s21 = scalar_lea.vmem %s17_s13, 256  ;;  %p225_p4 = scmp.lt.s32.totalorder %s17_s13, %s17_s13 }
   0xa   :  { %p221_p3 = scmp.ne.s32.totalorder %s17_s13, %s220_s21  ;;  %p226_p5 = scmp.lt.s32.totalorder %s220_s21, %s220_s21 }
   0xc   :  { %p227_p6 = por %p226_p5, %p225_p4 }
   0xe   :  { %p228_p7 = pnand %p227_p6, %p221_p3 }
  0x10   :  { %231 = shalt.err (!%p228_p7)
}
  0x11   :  { %s283_s22 = smov 128   ;;  %s284_s23 = smov 8  }
  0x12   :  { %22 = dma.hbm_to_vmem [thread:$0]  %s355_s0, 256, %s17_s13, [#allocation4], %s283_s22, %s283_s22, %s284_s23  }
  0x13   :  { %s285_s26 = smov [#allocation6]   ;;  %s232_s30 = scalar_lea.hbm %s356_s1, 64 }
  0x14   :  { %s29_s27 = sshll.u32 %s285_s26, 4  ;;  %p233_p8 = scmp.ne.s32.totalorder %s356_s1, %s232_s30  ;;  %s30_s27 = int_to_ptr.vmem [resolvable:$true] %s29_s27 }
  0x15   :  { %p236_p9 = scmp.lt.u32.totalorder %s232_s30, %s356_s1 }
  0x17   :  { %p238_p10 = pnand %p236_p9, %p233_p8 }
  0x19   :  { %241 = shalt.err (!%p238_p10)
}
  0x1a   :  { %s242_s8 = scalar_lea.vmem %s30_s27, 64  ;;  %p247_p12 = scmp.lt.s32.totalorder %s30_s27, %s30_s27 }
  0x1b   :  { %p243_p11 = scmp.ne.s32.totalorder %s30_s27, %s242_s8  ;;  %p248_p13 = scmp.lt.s32.totalorder %s242_s8, %s242_s8 }
  0x1d   :  { %p249_p0 = por %p248_p13, %p247_p12 }
  0x1f   :  { %p250_p1 = pnand %p249_p0, %p243_p11 }
  0x21   :  { %253 = shalt.err (!%p250_p1)
}
  0x22   :  { %32 = dma.hbm_to_vmem [thread:$0]  %s356_s1, 64, %s30_s27, [#allocation7]  }
  0x23   :  { %276 = dma.done.wait [#allocation4], 256  }
  0x24   :  { %277 = vsyncadd [#allocation4], 4294967040 }
  0x25   :  { %278 = dma.done.wait [#allocation7], 64  }
  0x26   :  { %279 = vsyncadd [#allocation7], 4294967232  ;;  %vm56_vm0 = vcmask 1043456   ;;  %v47_v0 = vld [vmem:[#allocation3] sm:$0xff]  ;;  %v48_v1 = vld [vmem:[#allocation3 + $0x8] sm:$0xff]  ;;  %vm45_vm1 = vcmask 25600   ;;  %v69_v12 = vlaneseq }
  0x27   :  { %v52_v2 = vcombine.high %v47_v0, %v47_v0  ;;  %v57_v3 = vsel %vm56_vm0, %v47_v0, 0.0  ;;  %v53_v4 = vcombine.high %v48_v1, %v48_v1  ;;  %v62_v6 = vsel %vm56_vm0, %v48_v1, 0.0  ;;  %v89_v11 = vld [vmem:[#allocation6] sm:$0xf]  ;;  %v191_v24 = vld [vmem:[%s357_s2] ss:$0 sm:$0xff] }
  0x28   :  { %v286_v10 = vmov 0.0   ;;  %vm287_vm2 = vmmov 0   ;;  %v70_v13 = vand.u32 127, %v69_v12  ;;  %v72_v14 = vshrl.u32 %v69_v12, 7  ;;  %s288_s11 = smov [#allocation8]  }
  0x29   :  { %v58_v5 = vsel %vm56_vm0, %v52_v2, 0.0  ;;  %v63_v7 = vsel %vm56_vm0, %v53_v4, 0.0  ;;  %46 = vst.msk [vmem:[#allocation2] sm:$0x3] %vm45_vm1, %v286_v10  ;;  %196 = vmatprep.subr.mxu0 %v286_v10  ;;  %198 = vmatprep.mubr.msk.f32.mxu0 %vm287_vm2, %v286_v10  ;;  %vm79_vm3 = vcmask 1041409   ;;  %vm97_vm4 = vcmask 31744  }
  0x2a   :  { %v59_v8 = vadd.f32 %v58_v5, %v57_v3  ;;  %v64_v9 = vadd.f32 %v63_v7, %v62_v6  ;;  %197 = vmatpush3.msk.msra.mxu0 %vm56_vm0, %v89_v11  ;;  %v73_v16 = vsub.s32 %v70_v13, %v72_v14  ;;  %s181_s12 = sshll.u32 %s288_s11, 4  ;;  %s182_s12 = int_to_ptr.vmem [resolvable:$true] %s181_s12 }
  0x2b   :  { %s254_s13 = scalar_lea.vmem %s182_s12, 32  ;;  %p259_p3 = scmp.lt.s32.totalorder %s182_s12, %s182_s12 }
  0x2c   :  { %60 = vadd.xlane.f32.xlu0 %v59_v8  ;;  %p255_p2 = scmp.ne.s32.totalorder %s182_s12, %s254_s13  ;;  %p260_p4 = scmp.lt.s32.totalorder %s254_s13, %s254_s13 }
  0x2e   :  { %p261_p5 = por %p260_p4, %p259_p3 }
  0x30   :  { %65 = vadd.xlane.f32.xlu0 %v64_v9  ;;  %v49_v20 = vld [vmem:[#allocation2] sm:$0x3]  ;;  %p262_p6 = pnand %p261_p5, %p255_p2 }
  0xb9   :  { %v61_v15 = vpop.xlane.xlu0 %60 }
  0xba   :  { %v74_v18 = vrot.slane %v61_v15, %v73_v16 }
  0xbd   :  { %v66_v17 = vpop.xlane.xlu0 %65 }
  0xbe   :  { %v78_v19 = vrot.slane %v66_v17, %v73_v16 }
  0xc0   :  { %v80_v21 = vsel %vm79_vm3, %v78_v19, %v74_v18 }
  0xc1   :  { %v82_v22 = vadd.f32 %v80_v21, %v49_v20 }
  0xc3   :  { %84 = vst.msk [vmem:[#allocation2] sm:$0x3] %vm45_vm1, %v82_v22 }
  0xca   :  { %v88_v23 = vld [vmem:[#allocation2] sm:$0x3] }
  0xcb   :  { %199 = vmatmul.mubr.msk.f32.vlgmr.msra.gmra.mrb[0].mxu0 %vm97_vm4, %v88_v23 }
 0x19e   :  { %v170_v25 = vpop.f32.mrb[0].mxu0 }
 0x19f   :  { %v171_v26 = vadd.f32 %v191_v24, %v170_v25  ;;  %v200_v27 = vpop.f32.mrb[1].mxu0 }
 0x1a1   :  { %174 = vst [vmem:[#allocation8] sm:$0x3] %v171_v26 }
 0x1a2   :  { %265 = shalt.err (!%p262_p6)
}
 0x1a3   :  { %s266_s16 = scalar_lea.hbm %s358_s3, 32 }
 0x1a4   :  { %p267_p7 = scmp.ne.s32.totalorder %s358_s3, %s266_s16  ;;  %p270_p8 = scmp.lt.u32.totalorder %s266_s16, %s358_s3 }
 0x1a6   :  { %p272_p9 = pnand %p270_p8, %p267_p7 }
 0x1a8   :  { %275 = shalt.err (!%p272_p9)
}
 0x1a9   :  { %184 = dma.vmem_to_hbm [thread:$0]  %s182_s12, 32, %s358_s3, [#allocation5]  }
 0x1aa   :  { %280 = dma.done.wait [#allocation5], 32  }
 0x1ab   :  { %281 = vsyncadd [#allocation5], 4294967264 }
 0x1ac   :  { %188 = vsyncpa [#allocation4], 1 }
 0x1ad   :  { %189 = vsyncpa [#allocation7], 1 }
 0x1ae   :  { %190 = vsyncpa [#allocation5], 1 }

// kernel: tpu_custom_call.1
= control target key start
LH: loop header
LB: loop body
LE: loop exit
PB: predicated region body
PF: predicated region fallthrough
CT: control target
= control target key end

     0   :  { %8 = vsyncpa [#allocation4], 0  ;;  %s355_s0 = inlined_call_operand.hbm [shape: f32[2,4,256], index: 0, kind: input, shape index: {}]   ;;  %s356_s1 = inlined_call_operand.hbm [shape: f32[4,128], index: 1, kind: input, shape index: {}]   ;;  %s357_s2 = inlined_call_operand.vmem [shape: f32[1,128], index: 2, kind: input, shape index: {}]   ;;  %s358_s3 = inlined_call_operand.hbm [shape: f32[2,128], index: 3, kind: output, shape index: {}]  }
   0x1   :  { %9 = vsyncpa [#allocation7], 0 }
   0x2   :  { %10 = vsyncpa [#allocation5], 0  ;;  %s282_s12 = smov [#allocation3]   ;;  %s210_s16 = scalar_lea.hbm %s355_s0, 256 }
   0x3   :  { %s16_s13 = sshll.u32 %s282_s12, 4  ;;  %p211_p0 = scmp.ne.s32.totalorder %s355_s0, %s210_s16  ;;  %s17_s13 = int_to_ptr.vmem [resolvable:$true] %s16_s13 }
   0x4   :  { %p214_p1 = scmp.lt.u32.totalorder %s210_s16, %s355_s0 }
   0x6   :  { %p216_p2 = pnand %p214_p1, %p211_p0 }
   0x8   :  { %219 = shalt.err (!%p216_p2)
}
   0x9   :  { %s220_s21 = scalar_lea.vmem %s17_s13, 256  ;;  %p225_p4 = scmp.lt.s32.totalorder %s17_s13, %s17_s13 }
   0xa   :  { %p221_p3 = scmp.ne.s32.totalorder %s17_s13, %s220_s21  ;;  %p226_p5 = scmp.lt.s32.totalorder %s220_s21, %s220_s21 }
   0xc   :  { %p227_p6 = por %p226_p5, %p225_p4 }
   0xe   :  { %p228_p7 = pnand %p227_p6, %p221_p3 }
  0x10   :  { %231 = shalt.err (!%p228_p7)
}
  0x11   :  { %s283_s22 = smov 128   ;;  %s284_s23 = smov 8  }
  0x12   :  { %22 = dma.hbm_to_vmem [thread:$0]  %s355_s0, 256, %s17_s13, [#allocation4], %s283_s22, %s283_s22, %s284_s23  }
  0x13   :  { %s285_s26 = smov [#allocation6]   ;;  %s232_s30 = scalar_lea.hbm %s356_s1, 64 }
  0x14   :  { %s29_s27 = sshll.u32 %s285_s26, 4  ;;  %p233_p8 = scmp.ne.s32.totalorder %s356_s1, %s232_s30  ;;  %s30_s27 = int_to_ptr.vmem [resolvable:$true] %s29_s27 }
  0x15   :  { %p236_p9 = scmp.lt.u32.totalorder %s232_s30, %s356_s1 }
  0x17   :  { %p238_p10 = pnand %p236_p9, %p233_p8 }
  0x19   :  { %241 = shalt.err (!%p238_p10)
}
  0x1a   :  { %s242_s8 = scalar_lea.vmem %s30_s27, 64  ;;  %p247_p12 = scmp.lt.s32.totalorder %s30_s27, %s30_s27 }
  0x1b   :  { %p243_p11 = scmp.ne.s32.totalorder %s30_s27, %s242_s8  ;;  %p248_p13 = scmp.lt.s32.totalorder %s242_s8, %s242_s8 }
  0x1d   :  { %p249_p0 = por %p248_p13, %p247_p12 }
  0x1f   :  { %p250_p1 = pnand %p249_p0, %p243_p11 }
  0x21   :  { %253 = shalt.err (!%p250_p1)
}
  0x22   :  { %32 = dma.hbm_to_vmem [thread:$0]  %s356_s1, 64, %s30_s27, [#allocation7]  }
  0x23   :  { %276 = dma.done.wait [#allocation4], 256  }
  0x24   :  { %277 = vsyncadd [#allocation4], 4294967040 }
  0x25   :  { %278 = dma.done.wait [#allocation7], 64  }
  0x26   :  { %279 = vsyncadd [#allocation7], 4294967232  ;;  %vm56_vm0 = vcmask 1043456   ;;  %v47_v0 = vld [vmem:[#allocation3] sm:$0xff]  ;;  %v48_v1 = vld [vmem:[#allocation3 + $0x8] sm:$0xff]  ;;  %vm45_vm1 = vcmask 25600   ;;  %v69_v12 = vlaneseq }
  0x27   :  { %v52_v2 = vcombine.high %v47_v0, %v47_v0  ;;  %v57_v3 = vsel %vm56_vm0, %v47_v0, 0.0  ;;  %v53_v4 = vcombine.high %v48_v1, %v48_v1  ;;  %v62_v6 = vsel %vm56_vm0, %v48_v1, 0.0  ;;  %v89_v11 = vld [vmem:[#allocation6] sm:$0xf]  ;;  %v191_v24 = vld [vmem:[%s357_s2] ss:$0 sm:$0xff] }
  0x28   :  { %v286_v10 = vmov 0.0   ;;  %vm287_vm2 = vmmov 0   ;;  %v70_v13 = vand.u32 127, %v69_v12  ;;  %v72_v14 = vshrl.u32 %v69_v12, 7  ;;  %s288_s11 = smov [#allocation8]  }
  0x29   :  { %v58_v5 = vsel %vm56_vm0, %v52_v2, 0.0  ;;  %v63_v7 = vsel %vm56_vm0, %v53_v4, 0.0  ;;  %46 = vst.msk [vmem:[#allocation2] sm:$0x3] %vm45_vm1, %v286_v10  ;;  %196 = vmatprep.subr.mxu0 %v286_v10  ;;  %198 = vmatprep.mubr.msk.f32.mxu0 %vm287_vm2, %v286_v10  ;;  %vm79_vm3 = vcmask 1041409   ;;  %vm97_vm4 = vcmask 31744  }
  0x2a   :  { %v59_v8 = vadd.f32 %v58_v5, %v57_v3  ;;  %v64_v9 = vadd.f32 %v63_v7, %v62_v6  ;;  %197 = vmatpush3.msk.msra.mxu0 %vm56_vm0, %v89_v11  ;;  %v73_v16 = vsub.s32 %v70_v13, %v72_v14  ;;  %s181_s12 = sshll.u32 %s288_s11, 4  ;;  %s182_s12 = int_to_ptr.vmem [resolvable:$true] %s181_s12 }
  0x2b   :  { %s254_s13 = scalar_lea.vmem %s182_s12, 32  ;;  %p259_p3 = scmp.lt.s32.totalorder %s182_s12, %s182_s12 }
  0x2c   :  { %60 = vadd.xlane.f32.xlu0 %v59_v8  ;;  %p255_p2 = scmp.ne.s32.totalorder %s182_s12, %s254_s13  ;;  %p260_p4 = scmp.lt.s32.totalorder %s254_s13, %s254_s13 }
  0x2e   :  { %p261_p5 = por %p260_p4, %p259_p3 }
  0x30   :  { %65 = vadd.xlane.f32.xlu0 %v64_v9  ;;  %v49_v20 = vld [vmem:[#allocation2] sm:$0x3]  ;;  %p262_p6 = pnand %p261_p5, %p255_p2 }
  0xb9   :  { %v61_v15 = vpop.xlane.xlu0 %60 }
  0xba   :  { %v74_v18 = vrot.slane %v61_v15, %v73_v16 }
  0xbd   :  { %v66_v17 = vpop.xlane.xlu0 %65 }
  0xbe   :  { %v78_v19 = vrot.slane %v66_v17, %v73_v16 }
  0xc0   :  { %v80_v21 = vsel %vm79_vm3, %v78_v19, %v74_v18 }
  0xc1   :  { %v82_v22 = vadd.f32 %v80_v21, %v49_v20 }
  0xc3   :  { %84 = vst.msk [vmem:[#allocation2] sm:$0x3] %vm45_vm1, %v82_v22 }
  0xca   :  { %v88_v23 = vld [vmem:[#allocation2] sm:$0x3] }
  0xcb   :  { %199 = vmatmul.mubr.msk.f32.vlgmr.msra.gmra.mrb[0].mxu0 %vm97_vm4, %v88_v23 }
 0x19e   :  { %v170_v25 = vpop.f32.mrb[0].mxu0 }
 0x19f   :  { %v171_v26 = vadd.f32 %v191_v24, %v170_v25  ;;  %v200_v27 = vpop.f32.mrb[1].mxu0 }
 0x1a1   :  { %174 = vst [vmem:[#allocation8] sm:$0x3] %v171_v26 }
 0x1a2   :  { %265 = shalt.err (!%p262_p6)
}
 0x1a3   :  { %s266_s16 = scalar_lea.hbm %s358_s3, 32 }
 0x1a4   :  { %p267_p7 = scmp.ne.s32.totalorder %s358_s3, %s266_s16  ;;  %p270_p8 = scmp.lt.u32.totalorder %s266_s16, %s358_s3 }
 0x1a6   :  { %p272_p9 = pnand %p270_p8, %p267_p7 }
 0x1a8   :  { %275 = shalt.err (!%p272_p9)
}
 0x1a9   :  { %184 = dma.vmem_to_hbm [thread:$0]  %s182_s12, 32, %s358_s3, [#allocation5]  }
 0x1aa   :  { %280 = dma.done.wait [#allocation5], 32  }
 0x1ab   :  { %281 = vsyncadd [#allocation5], 4294967264 }
 0x1ac   :  { %188 = vsyncpa [#allocation4], 1 }
 0x1ad   :  { %189 = vsyncpa [#allocation7], 1 }
 0x1ae   :  { %190 = vsyncpa [#allocation5], 1 }

</bundles_post_ra>
